<compile_context>
chip_gen: v6e
topology: v6e:2x2x1
jax: 0.10.0
libtpu: 0.0.40
codegen_flags: <defaults>
</compile_context>

<pallas_src>
import jax
import jax.numpy as jnp
import numpy as np
from jax.experimental import pallas as pl
from jax.experimental.pallas import tpu as pltpu


def _cross_head_kernel(zt_ref, x_ref, wq_ref, wkv_ref, kvb_ref, s_ref, o_ref):
    """One (bb batches, lxb lanes) tile per grid step.

    zt_ref : (bb, Lz, C)  template, channels on lanes (pre-transposed, tiny)
    x_ref  : (bb, C, lxb) search block, spatial on lanes (natural layout)
    wq_ref : (1, C)       folded q-path weight  (conv_x * wq)
    wkv_ref: (C, 3)       folded k/v-path weights [conv_z*wk | conv_z*wv*wo | 0]
    kvb_ref: (1, 3)       folded k/v biases       [bk        | bv(*wo)      | 1]
    s_ref  : (2,) SMEM    [bq, bo]
    o_ref  : (bb, 1, lxb) lane-dense output rows
    """
    wq_row = wq_ref[...]            # (1, C)
    wkv = wkv_ref[...]              # (C, 3)
    kv_bias = kvb_ref[...]          # (1, 3)
    bq = s_ref[0]
    bo = s_ref[1]
    bb = zt_ref.shape[0]

    def body(bi, carry):
        zt = zt_ref[bi]             # (Lz, C)   dynamic leading-axis ref index
        xb = x_ref[bi]              # (C, lxb)

        # 1x1 convs + folded scalar in-projections == channel matvecs (MXU).
        qp = jnp.dot(wq_row, xb, preferred_element_type=jnp.float32) + bq   # (1, lxb)
        # k | v | ones in one matvec; per-column biases come in as a broadcast
        # row (the third weight column is zero, its "bias" is 1.0 -> ones col).
        # NOTE: a single tall (bb*Lz, C)@(C,3) matmul was considered (review
        # opt 4) but would need a dynamic value-slice or a padded VMEM bounce;
        # the MXU has plenty of slack here, so the per-batch form is kept.
        kvo = jnp.dot(zt, wkv, preferred_element_type=jnp.float32) + kv_bias  # (Lz, 3)
        kp = kvo[:, 0:1]            # (Lz, 1)
        vo = kvo[:, 1:3]            # (Lz, 2) = [v | 1]

        # Scaled dot-product attention, head_dim = 1 => scale = 1.
        # Scores in (Lz, lxb): keys on sublanes, queries on lanes (lane-packed).
        s = kp * qp                                            # (Lz, lxb)
        m = jnp.max(s, axis=0, keepdims=True)                  # (1, lxb)
        e = jnp.exp(s - m)                                     # (Lz, lxb)
        # Numerator and denominator in ONE MXU matmul (frees VPU/XLU slots):
        #   nd[0] = sum_z v[z]*e[z, :],  nd[1] = sum_z e[z, :]
        nd = jax.lax.dot_general(vo, e, (((0,), (0,)), ((), ())),
                                 preferred_element_type=jnp.float32)  # (2, lxb)
        # Exact division of the (1, lxb) row only (preserves 1e-4 parity).
        o_ref[bi] = (nd[0:1, :] / nd[1:2, :] + bo).astype(o_ref.dtype)
        return carry

    # Bounded live ranges (vs a full static unroll) while still giving the LLO
    # scheduler a 2x-unrolled window.
    jax.lax.fori_loop(0, bb, body, None, unroll=2)


def cross_head_forward(z, x, params):
    """z: (B, C, Hz, Wz), x: (B, C, Hx, Wx); returns (B, 1, Hx, Wx)."""
    b, c, hz, wz_sp = z.shape
    bx_, cx, hx, wx_sp = x.shape
    assert b == bx_ and c == cx and c in params["convs"]

    conv_z_w, conv_z_b, conv_x_w, conv_x_b = params["convs"][c]
    a = params["attn3"]   # post-conv c == 1 => only cross_attn3 is reachable

    Lz = hz * wz_sp
    Lx = hx * wx_sp

    # x keeps its natural layout (no HBM transpose of the big tensor); only
    # cast when the caller did not already provide f32.
    x_flat = x.reshape(b, c, Lx)
    if x_flat.dtype != jnp.float32:
        x_flat = x_flat.astype(jnp.float32)
    # z is tiny: pre-transpose so the k/v matvec lands in (Lz, .) orientation.
    z_t = z.reshape(b, c, Lz).transpose(0, 2, 1)
    if z_t.dtype != jnp.float32:
        z_t = z_t.astype(jnp.float32)

    # Fold the scalar MHA in/out projections (embed_dim = 1) into the convs.
    wq_row = (conv_x_w.reshape(1, c) * a["wq"]).astype(jnp.float32)        # (1, C)
    wk_col = conv_z_w.reshape(c, 1) * a["wk"]                              # (C, 1)
    wv_col = conv_z_w.reshape(c, 1) * (a["wv"] * a["wo"])                  # (C, 1)
    wkv3 = jnp.concatenate(                                                # (C, 3)
        [wk_col, wv_col, jnp.zeros((c, 1), jnp.float32)], axis=1).astype(jnp.float32)
    bk_f = conv_z_b[0] * a["wk"] + a["bk"]
    bv_f = (conv_z_b[0] * a["wv"] + a["bv"]) * a["wo"]
    kv_bias = jnp.stack([bk_f, bv_f, jnp.ones_like(bk_f)]
                        ).reshape(1, 3).astype(jnp.float32)                # (1, 3)
    scalars = jnp.stack([conv_x_b[0] * a["wq"] + a["bq"], a["bo"]]
                        ).astype(jnp.float32)                              # (2,) SMEM

    # ----- batch blocking: ~4 MiB of input per grid step (HBM-bound) --------
    per_batch_bytes = 4 * (c * Lx + Lz * c + Lx)
    target_step_bytes = 4 << 20
    bb = int(max(1, min(b, target_step_bytes // per_batch_bytes)))
    grid_b = pl.cdiv(b, bb)            # cdiv: no divisibility requirement on b

    # ----- Lx split: keep blocks lane-dense (lxb % 128 == 0 or lxb == Lx),
    # aim for >= 4 pipelined steps and an even total (both v7x TCs busy), and
    # keep the x block under ~4 MiB.
    candidates = [1] + [n for n in (2, 3, 4, 6, 8, 16) if Lx % (n * 128) == 0]
    max_block = 4 << 20

    def ok_steps(n):
        t = grid_b * n
        return t >= 4 and t % 2 == 0

    def ok_size(n):
        return 4 * bb * c * (Lx // n) <= max_block

    n_lx = next((n for n in candidates if ok_steps(n) and ok_size(n)), None)
    if n_lx is None:
        n_lx = next((n for n in candidates if ok_size(n)), candidates[-1])
        if n_lx == 1 and grid_b == 1 and len(candidates) > 1:
            n_lx = candidates[1]   # give the pipeline / megacore >= 2 steps
    lxb = Lx // n_lx

    out = pl.pallas_call(
        _cross_head_kernel,
        out_shape=jax.ShapeDtypeStruct((b, 1, Lx), jnp.float32),
        grid_spec=pltpu.PrefetchScalarGridSpec(
            num_scalar_prefetch=0,
            grid=(grid_b, n_lx),
            in_specs=[
                pl.BlockSpec((bb, Lz, c), lambda ib, il: (ib, 0, 0)),     # z_t
                pl.BlockSpec((bb, c, lxb), lambda ib, il: (ib, 0, il)),   # x
                pl.BlockSpec((1, c), lambda ib, il: (0, 0)),              # wq row
                pl.BlockSpec((c, 3), lambda ib, il: (0, 0)),              # wk|wv|0
                pl.BlockSpec((1, 3), lambda ib, il: (0, 0)),              # bk|bv|1
                pl.BlockSpec(memory_space=pltpu.MemorySpace.SMEM),        # [bq, bo]
            ],
            out_specs=pl.BlockSpec((bb, 1, lxb), lambda ib, il: (ib, 0, il)),
        ),
        compiler_params=pltpu.CompilerParams(
            dimension_semantics=("parallel", "parallel")),
    )(z_t, x_flat, wq_row, wkv3, kv_bias, scalars)

    return out.reshape(b, 1, hx, wx_sp)


def init_params(key):
    """Deterministic synthetic parameters mirroring cross_HEAD.__init__ shapes."""
    params = {"convs": {}}
    for c in (64, 128, 320):
        key, k1, k2, k3, k4 = jax.random.split(key, 5)
        wz = jax.random.normal(k1, (1, c, 1, 1), jnp.float32) * (1.0 / c)
        bzc = jax.random.normal(k2, (1,), jnp.float32) * 0.1
        wxc = jax.random.normal(k3, (1, c, 1, 1), jnp.float32) * (1.0 / c)
        bxc = jax.random.normal(k4, (1,), jnp.float32) * 0.1
        params["convs"][c] = (wz, bzc, wxc, bxc)
    for name in ("attn1", "attn2", "attn3"):   # attn1/attn2 are dead code in forward
        key, k1, k2, k3, k4 = jax.random.split(key, 5)
        in_w = jax.random.normal(k1, (3,), jnp.float32)        # in_proj_weight (3*1, 1)
        in_b = jax.random.normal(k2, (3,), jnp.float32) * 0.1  # in_proj_bias (3,)
        out_w = jax.random.normal(k3, (), jnp.float32)         # out_proj.weight (1, 1)
        out_b = jax.random.normal(k4, (), jnp.float32) * 0.1   # out_proj.bias (1,)
        params[name] = {"wq": in_w[0], "wk": in_w[1], "wv": in_w[2],
                        "bq": in_b[0], "bk": in_b[1], "bv": in_b[2],
                        "wo": out_w, "bo": out_b}
    return params


def cross_head_ref(z, x, params):
    """Pure-JAX reference matching the PyTorch forward."""
    b, c, _, _ = z.shape
    _, _, hx, wx_sp = x.shape
    conv_z_w, conv_z_b, conv_x_w, conv_x_b = params["convs"][c]
    a = params["attn3"]
    hi = jax.lax.Precision.HIGHEST
    k = jnp.einsum("bchw,c->bhw", z, conv_z_w.reshape(c),
                   precision=hi).reshape(b, -1) + conv_z_b[0]
    q = jnp.einsum("bchw,c->bhw", x, conv_x_w.reshape(c),
                   precision=hi).reshape(b, -1) + conv_x_b[0]
    qp = q * a["wq"] + a["bq"]
    kp = k * a["wk"] + a["bk"]
    vp = k * a["wv"] + a["bv"]
    scores = qp[:, :, None] * kp[:, None, :]           # (b, Lx, Lz), scale = 1
    p = jax.nn.softmax(scores, axis=-1)
    out = jnp.sum(p * vp[:, None, :], axis=-1)         # (b, Lx)
    out = out * a["wo"] + a["bo"]
    return out.reshape(b, 1, hx, wx_sp)


if __name__ == "__main__":
    key = jax.random.PRNGKey(0)
    pkey, zkey, xkey, zkey2, xkey2 = jax.random.split(key, 5)
    params = init_params(pkey)

    # Config 1: 64-channel branch; Lx = 256 is 128-divisible -> Lx gets split
    # into two lane-dense blocks (pipelined / megacore-friendly grid).
    B, C, Hz, Wz, Hx, Wx = 2, 64, 8, 8, 16, 16
    z = jax.random.normal(zkey, (B, C, Hz, Wz), jnp.float32)
    x = jax.random.normal(xkey, (B, C, Hx, Wx), jnp.float32)
    out = jax.block_until_ready(cross_head_forward(z, x, params))
    ref = cross_head_ref(z, x, params)
    assert out.shape == (B, 1, Hx, Wx)
    np.testing.assert_allclose(np.asarray(out), np.asarray(ref),
                               rtol=1e-4, atol=1e-4)

    # Config 2: 128-channel branch, odd batch, Lx = 400 (not a multiple of 128)
    # -> full-extent lane block, single-step grid, exercises the cdiv blocking.
    B, C, Hz, Wz, Hx, Wx = 3, 128, 8, 8, 20, 20
    z = jax.random.normal(zkey2, (B, C, Hz, Wz), jnp.float32)
    x = jax.random.normal(xkey2, (B, C, Hx, Wx), jnp.float32)
    out = jax.block_until_ready(cross_head_forward(z, x, params))
    ref = cross_head_ref(z, x, params)
    np.testing.assert_allclose(np.asarray(out), np.asarray(ref),
                               rtol=1e-4, atol=1e-4)

    print("KERNEL_OK")
</pallas_src>

<mosaic_0001>
module attributes {stable_mosaic.version = 11 : i64} {
  func.func @_cross_head_kernel(%arg0: i32, %arg1: i32, %arg2: memref<2x64x64xf32, #tpu.memory_space<vmem>>, %arg3: memref<2x64x128xf32, #tpu.memory_space<vmem>>, %arg4: memref<1x64xf32, #tpu.memory_space<vmem>>, %arg5: memref<64x3xf32, #tpu.memory_space<vmem>>, %arg6: memref<1x3xf32, #tpu.memory_space<vmem>>, %arg7: memref<2xf32, #tpu.memory_space<smem>>, %arg8: memref<2x1x128xf32, #tpu.memory_space<vmem>>) attributes {dimension_semantics = [#tpu.dimension_semantics<parallel>, #tpu.dimension_semantics<parallel>], iteration_bounds = array<i64: 1, 2>, scalar_prefetch = 0 : i64, scratch_operands = 0 : i64, tpu.core_type = #tpu.core_type<tc>, window_params = [{transform_indices = @transform_0, window_bounds = array<i64: 2, 64, 64>}, {transform_indices = @transform_1, window_bounds = array<i64: 2, 64, 128>}, {pipeline_mode = #tpu.pipeline_mode<synchronous>, transform_indices = @transform_2, window_bounds = array<i64: 1, 64>}, {pipeline_mode = #tpu.pipeline_mode<synchronous>, transform_indices = @transform_3, window_bounds = array<i64: 64, 3>}, {pipeline_mode = #tpu.pipeline_mode<synchronous>, transform_indices = @transform_4, window_bounds = array<i64: 1, 3>}, {transform_indices = @transform_5, window_bounds = array<i64: 2>}, {transform_indices = @transform_6, window_bounds = array<i64: 2, 1, 128>}]} {
    %c0 = arith.constant 0 : index
    %c0_0 = arith.constant 0 : index
    %0 = vector.load %arg4[%c0, %c0_0] : memref<1x64xf32, #tpu.memory_space<vmem>>, vector<1x64xf32>
    %c0_1 = arith.constant 0 : index
    %c0_2 = arith.constant 0 : index
    %1 = vector.load %arg5[%c0_1, %c0_2] : memref<64x3xf32, #tpu.memory_space<vmem>>, vector<64x3xf32>
    %c0_3 = arith.constant 0 : index
    %c0_4 = arith.constant 0 : index
    %2 = vector.load %arg6[%c0_3, %c0_4] : memref<1x3xf32, #tpu.memory_space<vmem>>, vector<1x3xf32>
    %c0_5 = arith.constant 0 : index
    %3 = memref.load %arg7[%c0_5] : memref<2xf32, #tpu.memory_space<smem>>
    %c1 = arith.constant 1 : index
    %4 = memref.load %arg7[%c1] : memref<2xf32, #tpu.memory_space<smem>>
    %c0_i32 = arith.constant 0 : i32
    %5 = arith.index_cast %c0_i32 : i32 to index
    %c0_6 = arith.constant 0 : index
    %c0_7 = arith.constant 0 : index
    %6 = vector.load %arg2[%5, %c0_6, %c0_7] : memref<2x64x64xf32, #tpu.memory_space<vmem>>, vector<1x64x64xf32>
    %7 = vector.shape_cast %6 : vector<1x64x64xf32> to vector<64x64xf32>
    %8 = arith.index_cast %c0_i32 : i32 to index
    %c0_8 = arith.constant 0 : index
    %c0_9 = arith.constant 0 : index
    %9 = vector.load %arg3[%8, %c0_8, %c0_9] : memref<2x64x128xf32, #tpu.memory_space<vmem>>, vector<1x64x128xf32>
    %10 = vector.shape_cast %9 : vector<1x64x128xf32> to vector<64x128xf32>
    %cst = arith.constant dense<0.000000e+00> : vector<1x128xf32>
    %11 = tpu.matmul %0, %10, %cst {dimension_numbers = #tpu.dot_dimension_numbers<[1], [0], [0], [1], [0, 0, 1, 1], [], []>} : vector<1x64xf32>, vector<64x128xf32>, vector<1x128xf32> -> vector<1x128xf32>
    %12 = vector.broadcast %3 : f32 to vector<1x128xf32>
    %13 = arith.addf %11, %12 : vector<1x128xf32>
    %cst_10 = arith.constant dense<0.000000e+00> : vector<64x3xf32>
    %14 = tpu.matmul %7, %1, %cst_10 {dimension_numbers = #tpu.dot_dimension_numbers<[1], [0], [0], [1], [0, 0, 1, 1], [], []>} : vector<64x64xf32>, vector<64x3xf32>, vector<64x3xf32> -> vector<64x3xf32>
    %15 = vector.broadcast %2 : vector<1x3xf32> to vector<64x3xf32>
    %16 = arith.addf %14, %15 : vector<64x3xf32>
    %17 = vector.extract_strided_slice %16 {offsets = [0, 0], sizes = [64, 1], strides = [1, 1]} : vector<64x3xf32> to vector<64x1xf32>
    %18 = vector.extract_strided_slice %16 {offsets = [0, 1], sizes = [64, 2], strides = [1, 1]} : vector<64x3xf32> to vector<64x2xf32>
    %19 = vector.broadcast %17 : vector<64x1xf32> to vector<64x128xf32>
    %20 = vector.broadcast %13 : vector<1x128xf32> to vector<64x128xf32>
    %21 = arith.mulf %19, %20 : vector<64x128xf32>
    %cst_11 = arith.constant dense<0xFF800000> : vector<128xf32>
    %22 = vector.multi_reduction <maximumf>, %21, %cst_11 [0] : vector<64x128xf32> to vector<128xf32>
    %23 = vector.shape_cast %22 : vector<128xf32> to vector<1x128xf32>
    %24 = vector.broadcast %23 : vector<1x128xf32> to vector<64x128xf32>
    %25 = arith.subf %21, %24 : vector<64x128xf32>
    %26 = math.exp %25 : vector<64x128xf32>
    %cst_12 = arith.constant dense<0.000000e+00> : vector<2x128xf32>
    %27 = tpu.matmul %18, %26, %cst_12 {dimension_numbers = #tpu.dot_dimension_numbers<[0], [0], [1], [1], [0, 1, 1, 1], [], []>} : vector<64x2xf32>, vector<64x128xf32>, vector<2x128xf32> -> vector<2x128xf32>
    %28 = vector.extract_strided_slice %27 {offsets = [0, 0], sizes = [1, 128], strides = [1, 1]} : vector<2x128xf32> to vector<1x128xf32>
    %29 = vector.extract_strided_slice %27 {offsets = [1, 0], sizes = [1, 128], strides = [1, 1]} : vector<2x128xf32> to vector<1x128xf32>
    %30 = arith.divf %28, %29 : vector<1x128xf32>
    %31 = vector.broadcast %4 : f32 to vector<1x128xf32>
    %32 = arith.addf %30, %31 : vector<1x128xf32>
    %33 = arith.index_cast %c0_i32 : i32 to index
    %c0_13 = arith.constant 0 : index
    %c0_14 = arith.constant 0 : index
    %34 = vector.load %arg8[%33, %c0_13, %c0_14] : memref<2x1x128xf32, #tpu.memory_space<vmem>>, vector<1x1x128xf32>
    %35 = vector.shape_cast %34 : vector<1x1x128xf32> to vector<1x128xf32>
    %36 = vector.shape_cast %32 : vector<1x128xf32> to vector<1x1x128xf32>
    tpu.vector_store %arg8[%33, %c0_13, %c0_14], %36 {strides = array<i32>} : memref<2x1x128xf32, #tpu.memory_space<vmem>>, vector<1x1x128xf32>,
    %c1_i32 = arith.constant 1 : i32
    %37 = arith.index_cast %c1_i32 : i32 to index
    %c0_15 = arith.constant 0 : index
    %c0_16 = arith.constant 0 : index
    %38 = vector.load %arg2[%37, %c0_15, %c0_16] : memref<2x64x64xf32, #tpu.memory_space<vmem>>, vector<1x64x64xf32>
    %39 = vector.shape_cast %38 : vector<1x64x64xf32> to vector<64x64xf32>
    %40 = arith.index_cast %c1_i32 : i32 to index
    %c0_17 = arith.constant 0 : index
    %c0_18 = arith.constant 0 : index
    %41 = vector.load %arg3[%40, %c0_17, %c0_18] : memref<2x64x128xf32, #tpu.memory_space<vmem>>, vector<1x64x128xf32>
    %42 = vector.shape_cast %41 : vector<1x64x128xf32> to vector<64x128xf32>
    %cst_19 = arith.constant dense<0.000000e+00> : vector<1x128xf32>
    %43 = tpu.matmul %0, %42, %cst_19 {dimension_numbers = #tpu.dot_dimension_numbers<[1], [0], [0], [1], [0, 0, 1, 1], [], []>} : vector<1x64xf32>, vector<64x128xf32>, vector<1x128xf32> -> vector<1x128xf32>
    %44 = vector.broadcast %3 : f32 to vector<1x128xf32>
    %45 = arith.addf %43, %44 : vector<1x128xf32>
    %cst_20 = arith.constant dense<0.000000e+00> : vector<64x3xf32>
    %46 = tpu.matmul %39, %1, %cst_20 {dimension_numbers = #tpu.dot_dimension_numbers<[1], [0], [0], [1], [0, 0, 1, 1], [], []>} : vector<64x64xf32>, vector<64x3xf32>, vector<64x3xf32> -> vector<64x3xf32>
    %47 = vector.broadcast %2 : vector<1x3xf32> to vector<64x3xf32>
    %48 = arith.addf %46, %47 : vector<64x3xf32>
    %49 = vector.extract_strided_slice %48 {offsets = [0, 0], sizes = [64, 1], strides = [1, 1]} : vector<64x3xf32> to vector<64x1xf32>
    %50 = vector.extract_strided_slice %48 {offsets = [0, 1], sizes = [64, 2], strides = [1, 1]} : vector<64x3xf32> to vector<64x2xf32>
    %51 = vector.broadcast %49 : vector<64x1xf32> to vector<64x128xf32>
    %52 = vector.broadcast %45 : vector<1x128xf32> to vector<64x128xf32>
    %53 = arith.mulf %51, %52 : vector<64x128xf32>
    %cst_21 = arith.constant dense<0xFF800000> : vector<128xf32>
    %54 = vector.multi_reduction <maximumf>, %53, %cst_21 [0] : vector<64x128xf32> to vector<128xf32>
    %55 = vector.shape_cast %54 : vector<128xf32> to vector<1x128xf32>
    %56 = vector.broadcast %55 : vector<1x128xf32> to vector<64x128xf32>
    %57 = arith.subf %53, %56 : vector<64x128xf32>
    %58 = math.exp %57 : vector<64x128xf32>
    %cst_22 = arith.constant dense<0.000000e+00> : vector<2x128xf32>
    %59 = tpu.matmul %50, %58, %cst_22 {dimension_numbers = #tpu.dot_dimension_numbers<[0], [0], [1], [1], [0, 1, 1, 1], [], []>} : vector<64x2xf32>, vector<64x128xf32>, vector<2x128xf32> -> vector<2x128xf32>
    %60 = vector.extract_strided_slice %59 {offsets = [0, 0], sizes = [1, 128], strides = [1, 1]} : vector<2x128xf32> to vector<1x128xf32>
    %61 = vector.extract_strided_slice %59 {offsets = [1, 0], sizes = [1, 128], strides = [1, 1]} : vector<2x128xf32> to vector<1x128xf32>
    %62 = arith.divf %60, %61 : vector<1x128xf32>
    %63 = vector.broadcast %4 : f32 to vector<1x128xf32>
    %64 = arith.addf %62, %63 : vector<1x128xf32>
    %65 = arith.index_cast %c1_i32 : i32 to index
    %c0_23 = arith.constant 0 : index
    %c0_24 = arith.constant 0 : index
    %66 = vector.load %arg8[%65, %c0_23, %c0_24] : memref<2x1x128xf32, #tpu.memory_space<vmem>>, vector<1x1x128xf32>
    %67 = vector.shape_cast %66 : vector<1x1x128xf32> to vector<1x128xf32>
    %68 = vector.shape_cast %64 : vector<1x128xf32> to vector<1x1x128xf32>
    tpu.vector_store %arg8[%65, %c0_23, %c0_24], %68 {strides = array<i32>} : memref<2x1x128xf32, #tpu.memory_space<vmem>>, vector<1x1x128xf32>,
    %c2_i32 = arith.constant 2 : i32
    return
  }
  func.func @transform_0(%arg0: i32, %arg1: i32) -> (i32, i32, i32) {
    %c0_i32 = arith.constant 0 : i32
    %c0_i32_0 = arith.constant 0 : i32
    %c0_i32_1 = arith.constant 0 : i32
    return %arg0, %c0_i32, %c0_i32_0 : i32, i32, i32
  }
  func.func @transform_1(%arg0: i32, %arg1: i32) -> (i32, i32, i32) {
    %c0_i32 = arith.constant 0 : i32
    %c0_i32_0 = arith.constant 0 : i32
    return %arg0, %c0_i32, %arg1 : i32, i32, i32
  }
  func.func @transform_2(%arg0: i32, %arg1: i32) -> (i32, i32) {
    %c0_i32 = arith.constant 0 : i32
    %c0_i32_0 = arith.constant 0 : i32
    %c0_i32_1 = arith.constant 0 : i32
    return %c0_i32, %c0_i32_0 : i32, i32
  }
  func.func @transform_3(%arg0: i32, %arg1: i32) -> (i32, i32) {
    %c0_i32 = arith.constant 0 : i32
    %c0_i32_0 = arith.constant 0 : i32
    %c0_i32_1 = arith.constant 0 : i32
    return %c0_i32, %c0_i32_0 : i32, i32
  }
  func.func @transform_4(%arg0: i32, %arg1: i32) -> (i32, i32) {
    %c0_i32 = arith.constant 0 : i32
    %c0_i32_0 = arith.constant 0 : i32
    %c0_i32_1 = arith.constant 0 : i32
    return %c0_i32, %c0_i32_0 : i32, i32
  }
  func.func @transform_5(%arg0: i32, %arg1: i32) -> i32 {
    %c0_i32 = arith.constant 0 : i32
    %c0_i32_0 = arith.constant 0 : i32
    return %c0_i32 : i32
  }
  func.func @transform_6(%arg0: i32, %arg1: i32) -> (i32, i32, i32) {
    %c0_i32 = arith.constant 0 : i32
    %c0_i32_0 = arith.constant 0 : i32
    return %arg0, %c0_i32, %arg1 : i32, i32, i32
  }
}

</mosaic_0001>

<bundles_post_ra>
// kernel: tpu_custom_call.1
= control target key start
LH: loop header
LB: loop body
LE: loop exit
PB: predicated region body
PF: predicated region fallthrough
CT: control target
= control target key end

     0   :  { %s2374_s0 = inlined_call_operand.hbm [shape: f32[2,64,64], index: 0, kind: input, shape index: {}]   ;;  %s2375_s1 = inlined_call_operand.hbm [shape: f32[2,64,256], index: 1, kind: input, shape index: {}]   ;;  %s2376_s2 = inlined_call_operand.vmem [shape: f32[1,64], index: 2, kind: input, shape index: {}]   ;;  %s2377_s3 = inlined_call_operand.vmem [shape: f32[64,3], index: 3, kind: input, shape index: {}]   ;;  %s2378_s4 = inlined_call_operand.vmem [shape: f32[1,3], index: 4, kind: input, shape index: {}]   ;;  %s2379_s5 = inlined_call_operand.vmem [shape: f32[2], index: 5, kind: input, shape index: {}]   ;;  %s2380_s6 = inlined_call_operand.hbm [shape: f32[2,1,256], index: 6, kind: output, shape index: {}]  }
   0x1   :  { %2388 = sst [smem:[#allocation16_spill]] %s2374_s0 }
   0x2   :  { %2389 = sst [smem:[#allocation17_spill]] %s2379_s5 }
   0x3   :  { %11 = vsyncpa [#allocation3], 0 }
   0x4   :  { %12 = vsyncpa [#allocation7], 0 }
   0x5   :  { %14 = vsyncpa [#allocation7 + $0x1], 0 }
   0x6   :  { %15 = vsyncpa [#allocation5], 0 }
   0x7   :  { %16 = vsyncpa [#allocation4], 0 }
   0x8   :  { %18 = vsyncpa [#allocation4 + $0x1], 0  ;;  %s1950_s21 = smov 0   ;;  %s1952_s22 = smov 0  }
   0x9   :  { %s1954_s23 = smov 0   ;;  %s1956_s24 = smov 0  }
   0xa   :  { %s1958_s25 = smov 0   ;;  %s1960_s26 = smov 0  }
   0xb LB: > { %2390 = sst [smem:[#allocation14_spill]] %s1899_s26  ;;  %s1363_s27 = sadd.s32 4294967295, %s1899_s26   ;;  %s1899_s26 = sphi %s1960_s26, %s24_s26   ;;  %s1895_s25 = sphi %s1958_s25, %s2414_s25   ;;  %s1891_s24 = sphi %s1956_s24, %s2413_s24   ;;  %s1887_s23 = sphi %s1954_s23, %s2412_s23   ;;  %s1883_s22 = sphi %s1952_s22, %s2411_s22   ;;  %s1879_s21 = sphi %s1950_s21, %s2410_s21  }
   0xc   : > { %s1364_s28 = sadd.s32 4294967294, %s1899_s26   ;;  %p78_p0 = scmp.ne.s32.totalorder %s1887_s23, %s1883_s22 }
   0xd   : > { %p79_p1 = scmp.eq.s32.totalorder %s1899_s26, 0  ;;  %p84_p2 = scmp.ne.s32.totalorder %s1883_s22, %s1879_s21 }
   0xe   : > { %p1987_p3 = scmp.eq.s32.totalorder %s1363_s27, 0  ;;  %p194_p5 = scmp.eq.s32.totalorder %s1363_s27, 1 }
   0xf   : > { %p1991_p4 = por %p79_p1, %p78_p0  ;;  %p200_p7 = scmp.eq.s32.totalorder %s1364_s28, 1 }
  0x10   : > { %p1997_p6 = por %p1987_p3, %p84_p2  ;;  %p2001_p8 = por %p194_p5, %p78_p0 }
  0x11   : > { %p1365_p9 = scmp.ge.s32.totalorder %s1899_s26, 1  ;;  %p2006_p10 = por %p200_p7, %p84_p2 }
  0x12   : > { %s2393_s7 = scalar_select %p1997_p6, 1, 0 }
  0x13   : > { %s2394_s8 = scalar_select %p2001_p8, 1, 0 }
  0x14   : > { %s2395_s9 = scalar_select %p2006_p10, 1, 0 }
  0x15   : > { %p207_p11 = scmp.lt.s32.totalorder %s1899_s26, 3  ;;  %s1901_s11 = smov [#allocation2]  }
  0x16   : > { %2396 = sst [smem:[#allocation15_spill]] %s2395_s9  ;;  %s223_s12 = sshll.u32 %s1901_s11, 4  ;;  %s224_s12 = int_to_ptr.vmem [resolvable:$true] %s223_s12 }
  0x17   : > { %p2011_p12 = pnand %p1365_p9, %p207_p11  ;;  %p1640_p1 = scmp.lt.s32.totalorder %s1899_s26, 2 }
  0x18   : > { %s2399_s5 = sld [smem:[#allocation17_spill]]  ;;  %s1753_s18 = scalar_lea.vmem %s224_s12, 2048 }
  0x19   : > { %p1623_p13 = pneg %p2011_p12  ;;  %p2030_p2 = pnand %p1640_p1, %p1991_p4 }
  0x1a   : > { %p1754_p9 = scmp.ne.s32.totalorder %s224_s12, %s1753_s18  ;;  %p1761_p0 = scmp.lt.s32.totalorder %s224_s12, %s224_s12 }
  0x1b   : > { %p2021_p5 = pnand %p1623_p13, %p1987_p3  ;;  %p1762_p10 = scmp.lt.s32.totalorder %s1753_s18, %s1753_s18 }
  0x1d   : > { %p1744_p7 = pneg %p2021_p5  ;;  %p1763_p8 = por %p1762_p10, %p1761_p0 }
  0x1e   : > { %s246_s16 = sshll.u32 %s2399_s5, 4  ;;  %s247_s16 = int_to_ptr.vmem [resolvable:$true] %s246_s16 }
  0x1f   : > { %p1756_p11 = pnand %p1754_p9, %p1744_p7 }
  0x21   : > { %p1757_p13 = pneg %p1756_p11 }
  0x23   : > { %p1764_p6 = pnand %p1763_p8, %p1757_p13 }
  0x25   : > { %1767 = shalt.err (!%p1764_p6)
}
  0x26   : > { %s2383_s19 = smov 128   ;;  %s2384_s20 = smov 8  }
  0x27   : > { %s2401_s0 = sld [smem:[#allocation16_spill]]  ;;  %s1768_s30 = scalar_lea.vmem %s247_s16, 16 }
  0x28   : > { %p1769_p4 = scmp.ne.s32.totalorder %s247_s16, %s1768_s30  ;;  %p1776_p8 = scmp.lt.s32.totalorder %s247_s16, %s247_s16 }
  0x29   : > { %p1777_p6 = scmp.lt.s32.totalorder %s1768_s30, %s1768_s30 }
  0x2a   : > { %p1771_p1 = pnand %p1769_p4, %p1744_p7 }
  0x2b   : > { %p1778_p0 = por %p1777_p6, %p1776_p8 }
  0x2c   : > { %p1772_p10 = pneg %p1771_p1 }
  0x2d   : > { %1626 = dma.hbm_to_vmem [thread:$0]  (!%p2021_p5), %s2401_s0, 2048, %s224_s12, [#allocation3], %s2383_s19, %s2383_s19, %s2384_s20  }
  0x2e   : > { %p1779_p9 = pnand %p1778_p0, %p1772_p10 }
  0x30   : > { %1782 = shalt.err (!%p1779_p9)
}
  0x31   : > { %s1904_s11 = smov [#allocation8]   ;;  %s71_s12 = sadd.s32 1, %s1887_s23 }
  0x32   : > { %1629 = dma.vmem_to_smem (!%p2021_p5), %s247_s16, 16, %s1904_s11, [#allocation5]  }
  0x33   : > { %s33_s14 = sadd.s32 1, %s1895_s25  ;;  %s257_s15 = sand.u32 1, %s1887_s23  }
  0x34   : > { %p34_p7 = scmp.ge.s32.totalorder %s33_s14, 2  ;;  %s1369_s18 = sshll.u32 %s257_s15, 7 }
  0x35   : > { %s1370_s27 = sshll.u32 %s1895_s25, 7  ;;  %s261_s20 = scalar_lea.vmem [#allocation6], %s1369_s18 }
  0x36   : > { %s2416_s14 = smov (%p34_p7, %s33_s14), 0  ;;  %s269_s13 = scalar_lea.hbm %s2375_s1, %s1370_s27 }
  0x37   : > { %s67_s19 = ssub.s32 %s1895_s25, %s2416_s14  ;;  %s270_s0 = sshll.u32 %s261_s20, 4  ;;  %s271_s0 = int_to_ptr.vmem [resolvable:$true] %s270_s0 }
  0x38   : > { %p69_p11 = scmp.eq.s32.totalorder %s67_s19, 0  ;;  %s258_s11 = scalar_lea.sflag [#allocation7], %s257_s15 }
  0x39   : > { %p1785_p5 = pneg %p2030_p2  ;;  %s1796_s5 = scalar_lea.vmem %s271_s0, 2048 }
  0x3a   : > { %s2064_s16 = scalar_select %p69_p11, %s1887_s23, %s71_s12  }
  0x3b   : > { %p1797_p13 = scmp.ne.s32.totalorder %s271_s0, %s1796_s5  ;;  %s1905_s26 = smov [#allocation6]  }
  0x3c   : > { %s1801_s9 = sshll.u32 %s1905_s26, 4  ;;  %s1802_s9 = int_to_ptr.vmem [resolvable:$false] %s1801_s9 }
  0x3d   : > { %p1799_p4 = pnand %p1797_p13, %p1785_p5  ;;  %s1803_s28 = scalar_lea.vmem %s1802_s9, 4096 }
  0x3e   : > { %p1804_p10 = scmp.lt.s32.totalorder %s271_s0, %s1802_s9  ;;  %p1805_p8 = scmp.lt.s32.totalorder %s1803_s28, %s1796_s5 }
  0x3f   : > { %p1800_p1 = pneg %p1799_p4 }
  0x40   : > { %p1806_p6 = por %p1805_p8, %p1804_p10 }
  0x42   : > { %p1807_p0 = pnand %p1806_p6, %p1800_p1 }
  0x44   : > { %1810 = shalt.err (!%p1807_p0)
}
  0x45   : > { %s1906_s19 = smov 256   ;;  %s2402_s20 = smov 8  }
  0x46   : > { %s2403_s12 = smov 128   ;;  %282 = sbr.rel (%p2011_p12) target bundleno = 1283 (0x503), region = 44 }
  0x47   : > { %1633 = dma.hbm_to_vmem [thread:$0]  (!%p2030_p2), %s269_s13, 2048, %s271_s0, %s258_s11, %s1906_s19, %s2403_s12, %s2402_s20  }
  0x4b   : > { %1862 = dma.done.wait (%p1987_p3), [#allocation3], 2048  }
  0x4c   : > { %1864 = vsyncadd (%p1987_p3), [#allocation3], 4294965248  ;;  %s2079_s5 = sand.u32 1, %s1883_s22   ;;  %p2404_p2 = scmp.ne.s32.totalorder %s2393_s7, 0 }
  0x4d   : > { %s1373_s26 = sshll.u32 %s2079_s5, 7  ;;  %s289_s9 = scalar_lea.sflag [#allocation7], %s2079_s5 }
  0x4e   : > { %s2083_s17 = scalar_lea.vmem [#allocation6], %s1373_s26 }
  0x4f   : > { %1866 = dma.done.wait (%p2404_p2), %s289_s9, 2048  }
  0x50   : > { %1868 = vsyncadd (%p2404_p2), %s289_s9, 4294965248 }
  0x51   : > { %1870 = dma.done.wait (%p1987_p3), [#allocation5], 16  }
  0x52   : > { %1872 = vsyncadd (%p1987_p3), [#allocation5], 4294967280 }
  0x53   : > { %301 = sfence }
  0x54   : > { %v2096_v0 = vld [vmem:[%s2377_s3 + $0x38] sm:$0xff]  ;;  %v2101_v1 = vld [vmem:[%s2377_s3 + $0x30] sm:$0xff]  ;;  %vm358_vm0 = vcmask 523264   ;;  %v1907_v2 = vmov 0.0   ;;  %v2109_v3 = vld [vmem:[%s2377_s3 + $0x28] sm:$0xff]  ;;  %vm1908_vm1 = vmmov 0   ;;  %v607_v46 = vlaneseq }
  0x55   : > { %1498 = vmatprep.subr.mxu1 %v2096_v0  ;;  %1479 = vmatprep.subr.mxu0 %v1907_v2  ;;  %v341_v4 = vld [vmem:[#allocation2] sm:$0xff]  ;;  %v356_v6 = vld [vmem:[%s2083_s17 + $0x38] sm:$0xff]  ;;  %v355_v7 = vld [vmem:[%s2083_s17 + $0x30] sm:$0xff]  ;;  %v1909_v26 = vmov 0   ;;  %s1910_s29 = smov 127   ;;  %s2209_s7 = sld [smem:[#allocation8]] }
  0x56   : > { %1499 = vmatpush3.msra.mxu1 %v2096_v0  ;;  %1495 = vmatprep.mubr.msk.f32.mxu0 %vm1908_vm1, %v1907_v2  ;;  %v2119_v5 = vld [vmem:[%s2377_s3 + $0x20] sm:$0xff]  ;;  %v2128_v8 = vld [vmem:[%s2377_s3 + $0x18] sm:$0xff]  ;;  %v354_v9 = vld [vmem:[%s2083_s17 + $0x28] sm:$0xff]  ;;  %v2211_v48 = vshrl.u32 %v607_v46, 7  ;;  %s1375_s27 = sshll.u32 %s2079_s5, 1  ;;  %s1408_s11 = sshll.u32 %s1891_s24, 4 }
  0x57   : > { %1500 = vmatprep.subr.mxu1 %v2101_v1  ;;  %1514 = vmatprep.mubr.msk.f32.mxu1 %vm358_vm0, %v341_v4  ;;  %v2137_v10 = vld [vmem:[%s2377_s3 + $0x10] sm:$0xff]  ;;  %v353_v11 = vld [vmem:[%s2083_s17 + $0x20] sm:$0xff]  ;;  %v2146_v12 = vld [vmem:[%s2377_s3 + $0x8] sm:$0xff]  ;;  %s2286_s30 = scalar_lea.vmem [#allocation9], %s1375_s27  ;;  %s2323_s20 = scalar_lea.hbm %s2380_s6, %s1408_s11 }
  0x58   : > { %1501 = vmatpush3.msra.mxu1 %v2101_v1  ;;  %1480 = vmatpush3.msra.mxu0 %v356_v6  ;;  %v352_v13 = vld [vmem:[%s2083_s17 + $0x18] sm:$0xff]  ;;  %v2155_v14 = vld [vmem:[%s2377_s3] sm:$0xff]  ;;  %v351_v15 = vld [vmem:[%s2083_s17 + $0x10] sm:$0xff]  ;;  %v609_v53 = vsub.s32 0, %v2211_v48  ;;  %s1252_s13 = sshll.u32 %s2286_s30, 4  ;;  %s1237_s12 = scalar_lea.sflag [#allocation4], %s2079_s5  ;;  %s2318_s13 = int_to_ptr.vmem [resolvable:$true] %s1252_s13 }
  0x59   : > { %1502 = vmatprep.subr.mxu1 %v2109_v3  ;;  %1481 = vmatprep.subr.mxu0 %v1907_v2  ;;  %v342_v16 = vld [vmem:[#allocation2 + $0x8] sm:$0xff]  ;;  %v343_v17 = vld [vmem:[#allocation2 + $0x10] sm:$0xff]  ;;  %v349_v19 = vld [vmem:[%s2083_s17] sm:$0xff]  ;;  %s1811_s26 = scalar_lea.vmem %s2318_s13, 32  ;;  %p2405_p12 = scmp.ne.s32.totalorder %s2394_s8, 0 }
  0x5a   : > { %1503 = vmatpush3.msra.mxu1 %v2109_v3  ;;  %1482 = vmatpush3.msra.mxu0 %v355_v7  ;;  %v350_v18 = vld [vmem:[%s2083_s17 + $0x8] sm:$0xff]  ;;  %v344_v20 = vld [vmem:[#allocation2 + $0x18] sm:$0xff]  ;;  %v2172_v21 = vld [vmem:[%s2376_s2] sm:$0x1]  ;;  %p1812_p3 = scmp.ne.s32.totalorder %s2318_s13, %s1811_s26  ;;  %s1911_s24 = smov [#allocation9]  }
  0x5b   : > { %1504 = vmatprep.subr.mxu1 %v2119_v5  ;;  %1483 = vmatprep.subr.mxu0 %v1907_v2  ;;  %v345_v22 = vld [vmem:[#allocation2 + $0x20] sm:$0xff]  ;;  %v346_v23 = vld [vmem:[#allocation2 + $0x28] sm:$0xff]  ;;  %v347_v24 = vld [vmem:[#allocation2 + $0x30] sm:$0xff]  ;;  %v357_v49 = vstv %s2209_s7  ;;  %s1815_s9 = sshll.u32 %s1911_s24, 4  ;;  %s1816_s9 = int_to_ptr.vmem [resolvable:$false] %s1815_s9 }
  0x5c   : > { %1505 = vmatpush3.msra.mxu1 %v2119_v5  ;;  %1484 = vmatpush3.msra.mxu0 %v354_v9  ;;  %v348_v25 = vld [vmem:[#allocation2 + $0x38] sm:$0xff]  ;;  %v2191_v27 = vld [vmem:[%s2378_s4] ss:$0 sm:$0xff]  ;;  %v1393_v46 = vld [vmem:[%s2083_s17 + $0x68] sm:$0xff]  ;;  %p1813_p9 = pnand %p1812_p3, %p2405_p12  ;;  %s1817_s0 = scalar_lea.vmem %s1816_s9, 64 }
  0x5d   : > { %1506 = vmatprep.subr.mxu1 %v2128_v8  ;;  %1485 = vmatprep.subr.mxu0 %v1907_v2  ;;  %p1818_p11 = scmp.lt.s32.totalorder %s2318_s13, %s1816_s9  ;;  %p1819_p5 = scmp.lt.s32.totalorder %s1817_s0, %s1811_s26 }
  0x5e   : > { %1507 = vmatpush3.msra.mxu1 %v2128_v8  ;;  %1486 = vmatpush3.msra.mxu0 %v353_v11  ;;  %p1814_p7 = pneg %p1813_p9 }
  0x5f   : > { %1508 = vmatprep.subr.mxu1 %v2137_v10  ;;  %1487 = vmatprep.subr.mxu0 %v1907_v2  ;;  %p1820_p13 = por %p1819_p5, %p1818_p11 }
  0x60   : > { %1509 = vmatpush3.msra.mxu1 %v2137_v10  ;;  %1488 = vmatpush3.msra.mxu0 %v352_v13 }
  0x61   : > { %1510 = vmatprep.subr.mxu1 %v2146_v12  ;;  %1489 = vmatprep.subr.mxu0 %v1907_v2  ;;  %p1821_p4 = pnand %p1820_p13, %p1814_p7 }
  0x62   : > { %1511 = vmatpush3.msra.mxu1 %v2146_v12  ;;  %1490 = vmatpush3.msra.mxu0 %v351_v15 }
  0x63   : > { %1512 = vmatprep.subr.mxu1 %v2155_v14  ;;  %1491 = vmatprep.subr.mxu0 %v1907_v2 }
  0x64   : > { %1513 = vmatpush3.msra.mxu1 %v2155_v14  ;;  %1492 = vmatpush3.msra.mxu0 %v350_v18 }
  0x65   : > { %1515 = vmatmul.mubr.msk.f32.vlgmr.msra.gmra.mxu1 %vm358_vm0, %v342_v16  ;;  %1493 = vmatprep.subr.mxu0 %v1907_v2 }
  0x66   : > { %1517 = vmatprep.mubr.msk.f32.mxu1 %vm358_vm0, %v343_v17  ;;  %1545 = vmatprep.subr.mxu1 %v1907_v2 }
  0x67   : > { %1494 = vmatpush3.msra.mxu0 %v349_v19  ;;  %1704 = vset.pattern.permute.xlu0 %v1909_v26 }
  0x68   : > { %1496 = vmatmul.mubr.msk.f32.vlgmr.msra.gmra.mxu0 %vm358_vm0, %v2172_v21  ;;  %1526 = vmatprep.subr.mxu0 %v1907_v2 }
  0x69   : > { %1518 = vmatmul.mubr.msk.f32.gmra.mxu1 %vm358_vm0, %v344_v20  ;;  %1542 = vmatprep.mubr.msk.f32.mxu0 %vm1908_vm1, %v1907_v2 }
  0x6a   : > { %1520 = vmatprep.mubr.msk.f32.mxu1 %vm358_vm0, %v345_v22  ;;  %1705 = vset.pattern.permute.xlu1 %v1909_v26 }
  0x6d   : > { %1521 = vmatmul.mubr.msk.f32.gmra.mxu1 %vm358_vm0, %v346_v23 }
  0x6e   : > { %1523 = vmatprep.mubr.msk.f32.mxu1 %vm358_vm0, %v347_v24 }
  0x71   : > { %1524 = vmatmul.mubr.msk.f32.gmra.mxu1 %vm358_vm0, %v348_v25 }
  0x72   : > { %1561 = vmatprep.mubr.msk.f32.mxu1 %vm1908_vm1, %v1907_v2 }
 0x125   : > { %v1516_v28 = vpop.f32.mrf.mxu1 }
 0x126   : > { %v534_v29 = vadd.f32 %v1516_v28, %v2191_v27 }
 0x127   : > { %v528_v30 = vpop.f32.mrf.mxu1 }
 0x128   : > { %574 = vperm.xlu0 %1704, %v534_v29   ;;  %v428_v32 = vpop.f32.mrf.mxu0  ;;  %v529_v33 = vadd.f32 %v2191_v27, %v528_v30 }
 0x129   : > { %v1519_v31 = vpop.f32.mrf.mxu1  ;;  %v429_v52 = vadd.f32 %v428_v32, %v357_v49 }
 0x12a   : > { %v544_v34 = vadd.f32 %v1519_v31, %v2191_v27  ;;  %v1497_v36 = vpop.f32.mrf.mxu0 }
 0x12b   : > { %v538_v35 = vpop.f32.mrf.mxu1  ;;  %v610_v56 = vrot.slane %v429_v52, %v609_v53 }
 0x12c   : > { %584 = vperm.xlu1 %1705, %v544_v34   ;;  %569 = vperm.xlu0 %1704, %v529_v33   ;;  %v539_v38 = vadd.f32 %v2191_v27, %v538_v35 }
 0x12d   : > { %v1522_v37 = vpop.f32.mrf.mxu1 }
 0x12e   : > { %v554_v42 = vadd.f32 %v1522_v37, %v2191_v27 }
 0x12f   : > { %v548_v39 = vpop.f32.mrf.mxu1 }
 0x130   : > { %v549_v40 = vadd.f32 %v2191_v27, %v548_v39  ;;  %579 = vperm.xlu1 %1705, %v539_v38  }
 0x131   : > { %v1525_v41 = vpop.f32.mrf.mxu1 }
 0x132   : > { %589 = vperm.xlu0 %1704, %v549_v40   ;;  %v564_v45 = vadd.f32 %v1525_v41, %v2191_v27  ;;  %v1395_v41 = vld [vmem:[%s2083_s17 + $0x78] sm:$0xff] }
 0x133   : > { %v558_v43 = vpop.f32.mrf.mxu1  ;;  %1546 = vmatpush3.msra.mxu1 %v1395_v41 }
 0x134   : > { %v559_v44 = vadd.f32 %v2191_v27, %v558_v43  ;;  %594 = vperm.xlu1 %1705, %v554_v42   ;;  %1547 = vmatprep.subr.mxu1 %v1907_v2 }
 0x136   : > { %599 = vperm.xlu0 %1704, %v559_v44  }
 0x138   : > { %604 = vperm.xlu1 %1705, %v564_v45  }
 0x13a   : > { %656 = vrot.lane.b32.xlu0 %v529_v33, %s1910_s29 }
 0x13c   : > { %658 = vrot.lane.b32.xlu1 %v534_v29, %s1910_s29 }
 0x13e   : > { %660 = vrot.lane.b32.xlu0 %v539_v38, %s1910_s29 }
 0x140   : > { %662 = vrot.lane.b32.xlu1 %v544_v34, %s1910_s29 }
 0x142   : > { %664 = vrot.lane.b32.xlu0 %v549_v40, %s1910_s29 }
 0x144   : > { %666 = vrot.lane.b32.xlu1 %v554_v42, %s1910_s29  ;;  %v1394_v42 = vld [vmem:[%s2083_s17 + $0x70] sm:$0xff] }
 0x145   : > { %1548 = vmatpush3.msra.mxu1 %v1394_v42 }
 0x146   : > { %668 = vrot.lane.b32.xlu0 %v559_v44, %s1910_s29  ;;  %1549 = vmatprep.subr.mxu1 %v1907_v2 }
 0x147   : > { %1550 = vmatpush3.msra.mxu1 %v1393_v46 }
 0x148   : > { %670 = vrot.lane.b32.xlu1 %v564_v45, %s1910_s29  ;;  %1551 = vmatprep.subr.mxu1 %v1907_v2 }
 0x1a3   : > { %v575_v47 = vpop.permute.xlu0 %574 }
 0x1a4   : > { %v2219_v60 = vmul.f32 %v610_v56, %v575_v47 }
 0x1a7   : > { %v585_v50 = vpop.permute.xlu1 %584  ;;  %v570_v51 = vpop.permute.xlu0 %569 }
 0x1a8   : > { %v614_v63 = vmul.f32 %v610_v56, %v585_v50  ;;  %v2221_v6 = vmul.f32 %v610_v56, %v570_v51  ;;  %v1392_v51 = vld [vmem:[%s2083_s17 + $0x60] sm:$0xff] }
 0x1a9   : > { %1552 = vmatpush3.msra.mxu1 %v1392_v51 }
 0x1aa   : > { %1553 = vmatprep.subr.mxu1 %v1907_v2 }
 0x1ab   : > { %v580_v54 = vpop.permute.xlu1 %579 }
 0x1ac   : > { %v613_v7 = vmul.f32 %v610_v56, %v580_v54 }
 0x1ad   : > { %v590_v55 = vpop.permute.xlu0 %589 }
 0x1ae   : > { %v615_v61 = vmul.f32 %v610_v56, %v590_v55  ;;  %v1391_v55 = vld [vmem:[%s2083_s17 + $0x58] sm:$0xff] }
 0x1af   : > { %v595_v57 = vpop.permute.xlu1 %594  ;;  %1554 = vmatpush3.msra.mxu1 %v1391_v55 }
 0x1b0   : > { %v616_v58 = vmul.f32 %v610_v56, %v595_v57  ;;  %v619_v15 = vmax.f32 %v2221_v6, %v615_v61  ;;  %1555 = vmatprep.subr.mxu1 %v1907_v2 }
 0x1b1   : > { %v600_v59 = vpop.permute.xlu0 %599 }
 0x1b2   : > { %v617_v62 = vmul.f32 %v610_v56, %v600_v59  ;;  %v620_v9 = vmax.f32 %v2219_v60, %v616_v58 }
 0x1b3   : > { %v605_v4 = vpop.permute.xlu1 %604 }
 0x1b4   : > { %v618_v11 = vmul.f32 %v610_v56, %v605_v4  ;;  %v621_v16 = vmax.f32 %v613_v7, %v617_v62  ;;  %v623_v18 = vmax.f32 %v619_v15, %v620_v9  ;;  %v794_v15 = vld [vmem:[#allocation2 + $0x40] sm:$0xff] }
 0x1b5   : > { %v657_v13 = vpop.permute.xlu0 %656 }
 0x1b6   : > { %v622_v17 = vmax.f32 %v614_v63, %v618_v11  ;;  %680 = vxpose.xlu0.b32.start [1/8] (short) (narrow) %v657_v13, 8 }
 0x1b7   : > { %v659_v20 = vpop.permute.xlu1 %658 }
 0x1b8   : > { %v624_v19 = vmax.f32 %v621_v16, %v622_v17 }
 0x1b9   : > { %v661_v24 = vpop.permute.xlu0 %660 }
 0x1ba   : > { %v625_v22 = vmax.f32 %v623_v18, %v624_v19  ;;  %681 = vxpose.xlu0.b32.cont [2/8] (short) (narrow) %v659_v20, 8 }
 0x1bb   : > { %v663_v28 = vpop.permute.xlu1 %662 }
 0x1bc   : > { %v626_v23 = vrot.slane %v625_v22, 4 }
 0x1bd   : > { %v665_v31 = vpop.permute.xlu0 %664 }
 0x1be   : > { %v627_v25 = vmax.f32 %v625_v22, %v626_v23  ;;  %682 = vxpose.xlu0.b32.cont [3/8] (short) (narrow) %v661_v24, 8 }
 0x1bf   : > { %v667_v34 = vpop.permute.xlu1 %666 }
 0x1c0   : > { %v628_v26 = vrot.slane %v627_v25, 2 }
 0x1c1   : > { %v669_v38 = vpop.permute.xlu0 %668 }
 0x1c2   : > { %v629_v29 = vmax.f32 %v627_v25, %v628_v26  ;;  %683 = vxpose.xlu0.b32.cont [4/8] (short) (narrow) %v663_v28, 8 }
 0x1c3   : > { %v671_v45 = vpop.permute.xlu1 %670 }
 0x1c4   : > { %v630_v30 = vrot.slane %v629_v29, 1 }
 0x1c6   : > { %684 = vxpose.xlu0.b32.cont [5/8] (short) (narrow) %v665_v31, 8  ;;  %v631_v32 = vmax.f32 %v629_v29, %v630_v30 }
 0x1c8   : > { %v639_v33 = vsub.f32 %v618_v11, %v631_v32  ;;  %v638_v35 = vsub.f32 %v617_v62, %v631_v32  ;;  %v637_v36 = vsub.f32 %v616_v58, %v631_v32  ;;  %v636_v39 = vsub.f32 %v615_v61, %v631_v32  ;;  %v1390_v58 = vld [vmem:[%s2083_s17 + $0x50] sm:$0xff]  ;;  %v1388_v62 = vld [vmem:[%s2083_s17 + $0x40] sm:$0xff] }
 0x1c9   : > { %v635_v43 = vsub.f32 %v614_v63, %v631_v32  ;;  %v634_v47 = vsub.f32 %v613_v7, %v631_v32  ;;  %v633_v52 = vsub.f32 %v2219_v60, %v631_v32  ;;  %v632_v56 = vsub.f32 %v2221_v6, %v631_v32  ;;  %v1389_v60 = vld [vmem:[%s2083_s17 + $0x48] sm:$0xff]  ;;  %1556 = vmatpush3.msra.mxu1 %v1390_v58  ;;  %s2279_s17 = sld [smem:[#allocation8 + $0x1]] }
 0x1ca   : > { %685 = vxpose.xlu0.b32.cont [6/8] (short) (narrow) %v667_v34, 8  ;;  %v654_v37 = vmul.f32 1.442695, %v639_v33  ;;  %v652_v40 = vmul.f32 1.442695, %v638_v35  ;;  %1557 = vmatprep.subr.mxu1 %v1907_v2 }
 0x1cb   : > { %v650_v44 = vmul.f32 1.442695, %v637_v36  ;;  %v648_v50 = vmul.f32 1.442695, %v636_v39  ;;  %v646_v54 = vmul.f32 1.442695, %v635_v43  ;;  %1558 = vmatpush3.msra.mxu1 %v1389_v60 }
 0x1cc   : > { %1706 = vpow2.f32 %v654_v37  ;;  %v644_v57 = vmul.f32 1.442695, %v634_v47  ;;  %v642_v59 = vmul.f32 1.442695, %v633_v52  ;;  %v640_v61 = vmul.f32 1.442695, %v632_v56  ;;  %1559 = vmatprep.subr.mxu1 %v1907_v2 }
 0x1cd   : > { %1708 = vpow2.f32 %v652_v40  ;;  %1560 = vmatpush3.msra.mxu1 %v1388_v62 }
 0x1ce   : > { %686 = vxpose.xlu0.b32.cont [7/8] (short) (narrow) %v669_v38, 8  ;;  %1710 = vpow2.f32 %v650_v44  ;;  %1562 = vmatmul.mubr.msk.f32.vlgmr.msra.gmra.mxu1 %vm358_vm0, %v2172_v21 }
 0x1cf   : > { %1712 = vpow2.f32 %v648_v50  ;;  %1592 = vmatprep.subr.mxu1 %v1907_v2  ;;  %1608 = vmatprep.mubr.msk.f32.mxu1 %vm1908_vm1, %v1907_v2  ;;  %v790_v23 = vstv %s2279_s17 }
 0x1d0   : > { %1714 = vpow2.f32 %v646_v54 }
 0x1d1   : > { %1716 = vpow2.f32 %v644_v57 }
 0x1d2   : > { %687 = vxpose.xlu0.b32.end [8/8] (short) (narrow) %v671_v45, 8  ;;  %1718 = vpow2.f32 %v642_v59 }
 0x1d3   : > { %1720 = vpow2.f32 %v640_v61 }
 0x1d9   : > { %v1707_v63 = vpop.eup %1706 }
 0x1da   : > { %1527 = vmatpush3.msra.mxu0 %v1707_v63  ;;  %v1709_v4 = vpop.eup %1708 }
 0x1db   : > { %1528 = vmatprep.subr.mxu0 %v1907_v2  ;;  %v1711_v6 = vpop.eup %1710 }
 0x1dc   : > { %1529 = vmatpush3.msra.mxu0 %v1709_v4  ;;  %v1713_v7 = vpop.eup %1712 }
 0x1dd   : > { %1530 = vmatprep.subr.mxu0 %v1907_v2  ;;  %v1715_v9 = vpop.eup %1714 }
 0x1de   : > { %1531 = vmatpush3.msra.mxu0 %v1711_v6  ;;  %v1717_v21 = vpop.eup %1716 }
 0x1df   : > { %1532 = vmatprep.subr.mxu0 %v1907_v2  ;;  %v1719_v11 = vpop.eup %1718 }
 0x1e0   : > { %1533 = vmatpush3.msra.mxu0 %v1713_v7  ;;  %v1721_v13 = vpop.eup %1720 }
 0x1e1   : > { %1534 = vmatprep.subr.mxu0 %v1907_v2 }
 0x1e2   : > { %1535 = vmatpush3.msra.mxu0 %v1715_v9 }
 0x1e3   : > { %1536 = vmatprep.subr.mxu0 %v1907_v2 }
 0x1e4   : > { %1537 = vmatpush3.msra.mxu0 %v1717_v21 }
 0x1e5   : > { %1538 = vmatprep.subr.mxu0 %v1907_v2 }
 0x1e6   : > { %1539 = vmatpush3.msra.mxu0 %v1719_v11 }
 0x1e7   : > { %1540 = vmatprep.subr.mxu0 %v1907_v2 }
 0x1e8   : > { %1541 = vmatpush3.msra.mxu0 %v1721_v13 }
 0x1e9   : > { %1564 = vmatprep.subr.mxu0 %v2096_v0 }
 0x232   : > { %v696_v16 = vpop.trf.xlu0 }
 0x233   : > { %1543 = vmatmul.mubr.msk.f32.vlgmr.msra.gmra.mxu0 %vm358_vm0, %v696_v16 }
 0x234   : > { %1565 = vmatpush3.msra.mxu0 %v2096_v0  ;;  %1580 = vmatprep.mubr.msk.f32.mxu0 %vm358_vm0, %v794_v15  ;;  %v795_v0 = vld [vmem:[#allocation2 + $0x48] sm:$0xff] }
 0x235   : > { %1566 = vmatprep.subr.mxu0 %v2101_v1 }
 0x236   : > { %1567 = vmatpush3.msra.mxu0 %v2101_v1  ;;  %v796_v1 = vld [vmem:[#allocation2 + $0x50] sm:$0xff] }
 0x237   : > { %1568 = vmatprep.subr.mxu0 %v2109_v3 }
 0x238   : > { %1569 = vmatpush3.msra.mxu0 %v2109_v3  ;;  %v797_v3 = vld [vmem:[#allocation2 + $0x58] sm:$0xff] }
 0x239   : > { %1570 = vmatprep.subr.mxu0 %v2119_v5 }
 0x23a   : > { %1571 = vmatpush3.msra.mxu0 %v2119_v5  ;;  %v798_v5 = vld [vmem:[#allocation2 + $0x60] sm:$0xff] }
 0x23b   : > { %1572 = vmatprep.subr.mxu0 %v2128_v8 }
 0x23c   : > { %1573 = vmatpush3.msra.mxu0 %v2128_v8  ;;  %v799_v8 = vld [vmem:[#allocation2 + $0x68] sm:$0xff] }
 0x23d   : > { %1574 = vmatprep.subr.mxu0 %v2137_v10 }
 0x23e   : > { %1575 = vmatpush3.msra.mxu0 %v2137_v10  ;;  %v800_v10 = vld [vmem:[#allocation2 + $0x70] sm:$0xff] }
 0x23f   : > { %1576 = vmatprep.subr.mxu0 %v2146_v12 }
 0x240   : > { %1577 = vmatpush3.msra.mxu0 %v2146_v12  ;;  %v801_v12 = vld [vmem:[#allocation2 + $0x78] sm:$0xff] }
 0x241   : > { %1578 = vmatprep.subr.mxu0 %v2155_v14 }
 0x242   : > { %1579 = vmatpush3.msra.mxu0 %v2155_v14 }
 0x243   : > { %1581 = vmatmul.mubr.msk.f32.vlgmr.msra.gmra.mxu0 %vm358_vm0, %v795_v0 }
 0x244   : > { %1583 = vmatprep.mubr.msk.f32.mxu0 %vm358_vm0, %v796_v1 }
 0x247   : > { %1584 = vmatmul.mubr.msk.f32.gmra.mxu0 %vm358_vm0, %v797_v3 }
 0x248   : > { %1586 = vmatprep.mubr.msk.f32.mxu0 %vm358_vm0, %v798_v5 }
 0x24b   : > { %1587 = vmatmul.mubr.msk.f32.gmra.mxu0 %vm358_vm0, %v799_v8 }
 0x24c   : > { %1589 = vmatprep.mubr.msk.f32.mxu0 %vm358_vm0, %v800_v10 }
 0x24f   : > { %1590 = vmatmul.mubr.msk.f32.gmra.mxu0 %vm358_vm0, %v801_v12 }
 0x28e   : > { %v877_v14 = vpop.f32.mrf.mxu1 }
 0x28f   : > { %v878_v52 = vadd.f32 %v877_v14, %v357_v49 }
 0x290   : > { %v1563_v17 = vpop.f32.mrf.mxu1 }
 0x291   : > { %v1053_v55 = vrot.slane %v878_v52, %v609_v53 }
 0x2f3   : > { %v781_v18 = vpop.f32.mrf.mxu0 }
 0x2f4   : > { %v786_v19 = vrot.slane %v781_v18, 1 }
 0x2f5   : > { %v1544_v20 = vpop.f32.mrf.mxu0 }
 0x2f6   : > { %1722 = vrcp.f32 %v786_v19 }
 0x303   : > { %v1723_v22 = vpop.eup %1722  ;;  %v1582_v24 = vpop.f32.mrf.mxu0 }
 0x304   : > { %v789_v25 = vmul.f32 %v1723_v22, %v781_v18  ;;  %v977_v26 = vadd.f32 %v1582_v24, %v2191_v27 }
 0x305   : > { %v971_v28 = vpop.f32.mrf.mxu0 }
 0x306   : > { %v791_v29 = vadd.f32 %v790_v23, %v789_v25  ;;  %1017 = vperm.xlu1 %1705, %v977_v26   ;;  %v972_v33 = vadd.f32 %v2191_v27, %v971_v28 }
 0x307   : > { %v1585_v30 = vpop.f32.mrf.mxu0 }
 0x308   : > { %792 = vst [vmem:[%s2286_s30] sm:$0x1] %v791_v29  ;;  %v987_v37 = vadd.f32 %v1585_v30, %v2191_v27 }
 0x309   : > { %v981_v31 = vpop.f32.mrf.mxu0 }
 0x30a   : > { %1101 = vrot.lane.b32.xlu1 %v977_v26, %s1910_s29  ;;  %v982_v38 = vadd.f32 %v2191_v27, %v981_v31 }
 0x30b   : > { %v1588_v32 = vpop.f32.mrf.mxu0 }
 0x30c   : > { %v997_v39 = vadd.f32 %v1588_v32, %v2191_v27 }
 0x30d   : > { %v991_v34 = vpop.f32.mrf.mxu0 }
 0x30e   : > { %1012 = vperm.xlu1 %1705, %v972_v33   ;;  %v992_v40 = vadd.f32 %v2191_v27, %v991_v34 }
 0x30f   : > { %v1591_v35 = vpop.f32.mrf.mxu0 }
 0x310   : > { %v1007_v36 = vadd.f32 %v1591_v35, %v2191_v27 }
 0x311   : > { %v1001_v41 = vpop.f32.mrf.mxu0 }
 0x312   : > { %1099 = vrot.lane.b32.xlu1 %v972_v33, %s1910_s29  ;;  %1113 = vrot.lane.b32.xlu0 %v1007_v36, %s1910_s29  ;;  %v1002_v42 = vadd.f32 %v2191_v27, %v1001_v41 }
 0x316   : > { %1027 = vperm.xlu1 %1705, %v987_v37  }
 0x31a   : > { %1022 = vperm.xlu1 %1705, %v982_v38  }
 0x31e   : > { %1103 = vrot.lane.b32.xlu1 %v982_v38, %s1910_s29 }
 0x322   : > { %1037 = vperm.xlu1 %1705, %v997_v39  }
 0x326   : > { %1032 = vperm.xlu1 %1705, %v992_v40  }
 0x32a   : > { %1047 = vperm.xlu1 %1705, %v1007_v36  }
 0x32e   : > { %1042 = vperm.xlu1 %1705, %v1002_v42  }
 0x332   : > { %1105 = vrot.lane.b32.xlu1 %v987_v37, %s1910_s29 }
 0x336   : > { %1107 = vrot.lane.b32.xlu1 %v992_v40, %s1910_s29 }
 0x33a   : > { %1109 = vrot.lane.b32.xlu1 %v997_v39, %s1910_s29 }
 0x33e   : > { %1111 = vrot.lane.b32.xlu1 %v1002_v42, %s1910_s29 }
 0x381   : > { %v1018_v43 = vpop.permute.xlu1 %1017 }
 0x382   : > { %v1055_v61 = vmul.f32 %v1053_v55, %v1018_v43 }
 0x384   : > { %v1114_v12 = vpop.permute.xlu0 %1113 }
 0x385   : > { %v1102_v44 = vpop.permute.xlu1 %1101 }
 0x389   : > { %v1013_v45 = vpop.permute.xlu1 %1012 }
 0x38a   : > { %v1054_v58 = vmul.f32 %v1053_v55, %v1013_v45 }
 0x38d   : > { %v1100_v46 = vpop.permute.xlu1 %1099 }
 0x38e   : > { %1123 = vxpose.xlu1.b32.start [1/8] (short) (narrow) %v1100_v46, 8 }
 0x391   : > { %v1028_v47 = vpop.permute.xlu1 %1027 }
 0x392   : > { %1124 = vxpose.xlu1.b32.cont [2/8] (short) (narrow) %v1102_v44, 8  ;;  %v1057_v63 = vmul.f32 %v1053_v55, %v1028_v47 }
 0x395   : > { %v1023_v50 = vpop.permute.xlu1 %1022 }
 0x396   : > { %v1056_v4 = vmul.f32 %v1053_v55, %v1023_v50 }
 0x399   : > { %v1104_v51 = vpop.permute.xlu1 %1103 }
 0x39a   : > { %1125 = vxpose.xlu1.b32.cont [3/8] (short) (narrow) %v1104_v51, 8 }
 0x39d   : > { %v1038_v27 = vpop.permute.xlu1 %1037 }
 0x39e   : > { %v1059_v59 = vmul.f32 %v1053_v55, %v1038_v27 }
 0x3a0   : > { %v1063_v9 = vmax.f32 %v1055_v61, %v1059_v59 }
 0x3a1   : > { %v1033_v54 = vpop.permute.xlu1 %1032 }
 0x3a2   : > { %v1058_v57 = vmul.f32 %v1053_v55, %v1033_v54 }
 0x3a4   : > { %v1062_v6 = vmax.f32 %v1054_v58, %v1058_v57 }
 0x3a5   : > { %v1048_v56 = vpop.permute.xlu1 %1047 }
 0x3a6   : > { %v1061_v60 = vmul.f32 %v1053_v55, %v1048_v56  ;;  %v1066_v49 = vmax.f32 %v1062_v6, %v1063_v9 }
 0x3a8   : > { %v1065_v21 = vmax.f32 %v1057_v63, %v1061_v60 }
 0x3a9   : > { %v1043_v62 = vpop.permute.xlu1 %1042 }
 0x3aa   : > { %v1060_v7 = vmul.f32 %v1053_v55, %v1043_v62 }
 0x3ac   : > { %v1064_v11 = vmax.f32 %v1056_v4, %v1060_v7 }
 0x3ad   : > { %v1106_v13 = vpop.permute.xlu1 %1105 }
 0x3ae   : > { %v1067_v15 = vmax.f32 %v1064_v11, %v1065_v21  ;;  %1126 = vxpose.xlu1.b32.cont [4/8] (short) (narrow) %v1106_v13, 8 }
 0x3b0   : > { %v1068_v48 = vmax.f32 %v1066_v49, %v1067_v15 }
 0x3b1   : > { %v1108_v53 = vpop.permute.xlu1 %1107 }
 0x3b2   : > { %v1069_v16 = vrot.slane %v1068_v48, 4  ;;  %1127 = vxpose.xlu1.b32.cont [5/8] (short) (narrow) %v1108_v53, 8 }
 0x3b4   : > { %v1070_v0 = vmax.f32 %v1068_v48, %v1069_v16 }
 0x3b5   : > { %v1110_v1 = vpop.permute.xlu1 %1109 }
 0x3b6   : > { %v1071_v3 = vrot.slane %v1070_v0, 2  ;;  %1128 = vxpose.xlu1.b32.cont [6/8] (short) (narrow) %v1110_v1, 8 }
 0x3b8   : > { %v1072_v5 = vmax.f32 %v1070_v0, %v1071_v3 }
 0x3b9   : > { %v1112_v8 = vpop.permute.xlu1 %1111 }
 0x3ba   : > { %v1073_v10 = vrot.slane %v1072_v5, 1  ;;  %1129 = vxpose.xlu1.b32.cont [7/8] (short) (narrow) %v1112_v8, 8 }
 0x3bc   : > { %v1074_v14 = vmax.f32 %v1072_v5, %v1073_v10 }
 0x3be   : > { %1130 = vxpose.xlu1.b32.end [8/8] (short) (narrow) %v1114_v12, 8  ;;  %v1082_v17 = vsub.f32 %v1061_v60, %v1074_v14  ;;  %v1081_v18 = vsub.f32 %v1060_v7, %v1074_v14  ;;  %v1080_v19 = vsub.f32 %v1059_v59, %v1074_v14  ;;  %v1079_v22 = vsub.f32 %v1058_v57, %v1074_v14 }
 0x3bf   : > { %v1078_v25 = vsub.f32 %v1057_v63, %v1074_v14  ;;  %v1077_v28 = vsub.f32 %v1056_v4, %v1074_v14  ;;  %v1076_v30 = vsub.f32 %v1055_v61, %v1074_v14  ;;  %v1075_v32 = vsub.f32 %v1054_v58, %v1074_v14 }
 0x3c0   : > { %v1097_v20 = vmul.f32 1.442695, %v1082_v17  ;;  %v1095_v24 = vmul.f32 1.442695, %v1081_v18  ;;  %v1093_v26 = vmul.f32 1.442695, %v1080_v19 }
 0x3c1   : > { %v1091_v29 = vmul.f32 1.442695, %v1079_v22  ;;  %v1089_v31 = vmul.f32 1.442695, %v1078_v25  ;;  %v1087_v33 = vmul.f32 1.442695, %v1077_v28 }
 0x3c2   : > { %1724 = vpow2.f32 %v1097_v20  ;;  %v1085_v34 = vmul.f32 1.442695, %v1076_v30  ;;  %v1083_v35 = vmul.f32 1.442695, %v1075_v32 }
 0x3c3   : > { %1726 = vpow2.f32 %v1095_v24 }
 0x3c4   : > { %1728 = vpow2.f32 %v1093_v26 }
 0x3c5   : > { %1730 = vpow2.f32 %v1091_v29 }
 0x3c6   : > { %1732 = vpow2.f32 %v1089_v31 }
 0x3c7   : > { %1734 = vpow2.f32 %v1087_v33 }
 0x3c8   : > { %1736 = vpow2.f32 %v1085_v34 }
 0x3c9   : > { %1738 = vpow2.f32 %v1083_v35 }
 0x3cf   : > { %v1725_v36 = vpop.eup %1724 }
 0x3d0   : > { %1593 = vmatpush3.msra.mxu1 %v1725_v36  ;;  %v1727_v37 = vpop.eup %1726 }
 0x3d1   : > { %1594 = vmatprep.subr.mxu1 %v1907_v2  ;;  %v1729_v38 = vpop.eup %1728 }
 0x3d2   : > { %1595 = vmatpush3.msra.mxu1 %v1727_v37  ;;  %v1731_v39 = vpop.eup %1730 }
 0x3d3   : > { %1596 = vmatprep.subr.mxu1 %v1907_v2  ;;  %v1733_v40 = vpop.eup %1732 }
 0x3d4   : > { %1597 = vmatpush3.msra.mxu1 %v1729_v38  ;;  %v1735_v41 = vpop.eup %1734 }
 0x3d5   : > { %1598 = vmatprep.subr.mxu1 %v1907_v2  ;;  %v1737_v42 = vpop.eup %1736 }
 0x3d6   : > { %1599 = vmatpush3.msra.mxu1 %v1731_v39  ;;  %v1739_v43 = vpop.eup %1738 }
 0x3d7   : > { %1600 = vmatprep.subr.mxu1 %v1907_v2 }
 0x3d8   : > { %1601 = vmatpush3.msra.mxu1 %v1733_v40 }
 0x3d9   : > { %1602 = vmatprep.subr.mxu1 %v1907_v2 }
 0x3da   : > { %1603 = vmatpush3.msra.mxu1 %v1735_v41 }
 0x3db   : > { %1604 = vmatprep.subr.mxu1 %v1907_v2 }
 0x3dc   : > { %1605 = vmatpush3.msra.mxu1 %v1737_v42 }
 0x3dd   : > { %1606 = vmatprep.subr.mxu1 %v1907_v2 }
 0x3de   : > { %1607 = vmatpush3.msra.mxu1 %v1739_v43 }
 0x41e   : > { %v1139_v44 = vpop.trf.xlu1 }
 0x41f   : > { %1609 = vmatmul.mubr.msk.f32.vlgmr.msra.gmra.mxu1 %vm358_vm0, %v1139_v44 }
 0x4df   : > { %v1224_v45 = vpop.f32.mrf.mxu1 }
 0x4e0   : > { %v1229_v46 = vrot.slane %v1224_v45, 1 }
 0x4e1   : > { %v1610_v47 = vpop.f32.mrf.mxu1 }
 0x4e2   : > { %1740 = vrcp.f32 %v1229_v46 }
 0x4ef   : > { %v1741_v50 = vpop.eup %1740 }
 0x4f0   : > { %v1232_v51 = vmul.f32 %v1741_v50, %v1224_v45 }
 0x4f2   : > { %v1233_v2 = vadd.f32 %v1232_v51, %v790_v23 }
 0x4f4   : > { %1406 = vst [vmem:[%s2286_s30 + $0x1] sm:$0x1] %v1233_v2 }
 0x4f5   : > { %1824 = shalt.err (!%p1821_p4)
}
 0x4f6   : > { %s1825_s10 = scalar_lea.hbm %s2323_s20, 32  ;;  %s1829_s29 = scalar_lea.hbm %s2380_s6, 64 }
 0x4f7   : > { %p1826_p1 = scmp.ne.s32.totalorder %s2323_s20, %s1825_s10  ;;  %p1830_p6 = scmp.lt.s32.totalorder %s2323_s20, %s2380_s6 }
 0x4f8   : > { %p1831_p0 = scmp.lt.s32.totalorder %s1829_s29, %s1825_s10 }
 0x4f9   : > { %p1827_p10 = pnand %p1826_p1, %p2405_p12 }
 0x4fa   : > { %p1832_p2 = por %p1831_p0, %p1830_p6 }
 0x4fb   : > { %p1828_p8 = pneg %p1827_p10 }
 0x4fd   : > { %p1833_p3 = pnand %p1832_p2, %p1828_p8 }
 0x4ff   : > { %1836 = shalt.err (!%p1833_p3)
}
 0x500   : > { %s1912_s27 = smov 16   ;;  %s1913_s30 = smov 32  }
 0x501   : > { %s1914_s11 = smov 1  }
 0x502   : > { %1621 = dma.vmem_to_hbm [thread:$0]  (%p2405_p12), %s2318_s13, 32, %s2323_s20, %s1237_s12, %s1912_s27, %s1913_s30, %s1914_s11  }
 0x503 PF: > { %s2406_s28 = sld [smem:[#allocation15_spill]]  ;;  %s1267_s26 = sand.u32 1, %s1879_s21  }
 0x504   : > { %s2407_s19 = sld [smem:[#allocation14_spill]]  ;;  %s1268_s24 = scalar_lea.sflag [#allocation4], %s1267_s26 }
 0x509   : > { %p2408_p9 = scmp.ne.s32.totalorder %s2406_s28, 0 }
 0x50a   : > { %p2409_p7 = scmp.ge.s32.totalorder %s2407_s19, 2 }
 0x50c   : > { %p1635_p11 = pnand %p2409_p7, %p2408_p9 }
 0x50e   : > { %p1636_p5 = pneg %p1635_p11 }
 0x510   : > { %1874 = dma.done.wait (%p1636_p5), %s1268_s24, 32  }
 0x511   : > { %1876 = vsyncadd (%p1636_p5), %s1268_s24, 4294967264  ;;  %s24_s26 = sadd.s32 1, %s2407_s19   ;;  %s2410_s21 = smov %s1883_s22 }
 0x512   : > { %p21_p13 = scmp.ge.s32.totalorder %s24_s26, 4   ;;  %s2411_s22 = smov %s1887_s23 }
 0x513   : > { %s2412_s23 = smov %s2064_s16  ;;  %s2413_s24 = smov %s1895_s25 }
 0x514   : > { %s2414_s25 = smov %s2416_s14  ;;  %23 = sbr.rel (!%p21_p13) target bundleno = 11 (0xb), region = 103 }
 0x519   :  { %1273 = vsyncpa [#allocation3], 1 }
 0x51a   :  { %1275 = vsyncpa [#allocation3 + $0x1], 1 }
 0x51b   :  { %1276 = vsyncpa [#allocation7], 1 }
 0x51c   :  { %1278 = vsyncpa [#allocation7 + $0x1], 1 }
 0x51d   :  { %1279 = vsyncpa [#allocation4], 1 }
 0x51e   :  { %1281 = vsyncpa [#allocation4 + $0x1], 1 }
 0x51f   :  { %1282 = vsyncpa [#allocation5], 1 }
 0x520   :  { %1284 = vsyncpa [#allocation5 + $0x1], 1 }

</bundles_post_ra>
